<compile_context>
chip_gen: v6e
topology: v6e:2x2x1
jax: 0.10.0
libtpu: 0.0.40
codegen_flags: <defaults>
</compile_context>

<pallas_src>
import functools

import numpy as np
import jax
import jax.numpy as jnp
from jax.experimental import pallas as pl
from jax.experimental.pallas import tpu as pltpu


# ----------------------------------------------------------------------------
# B-spline basis construction (pure numpy, mirrors bs()/spline_factory(),
# Cox-de Boor recursion instead of scipy.interpolate.splev).  Host-side
# precompute, exactly as in the PyTorch module (done once, lazily).
# ----------------------------------------------------------------------------
def _cox_de_boor_basis(x, knots, degree):
    x = np.asarray(x, dtype=np.float64)
    knots = np.asarray(knots, dtype=np.float64)
    n_knots = len(knots)
    n_basis = n_knots - degree - 1

    # degree-0 basis
    B = np.zeros((x.shape[0], n_knots - 1), dtype=np.float64)
    for i in range(n_knots - 1):
        if knots[i] < knots[i + 1]:
            B[:, i] = ((x >= knots[i]) & (x < knots[i + 1])).astype(np.float64)
    # closed right endpoint on the last non-degenerate interval (splev convention)
    nz = [i for i in range(n_knots - 1) if knots[i] < knots[i + 1]]
    if nz:
        last = nz[-1]
        B[:, last] = np.where(
            (x >= knots[last]) & (x <= knots[last + 1]), 1.0, B[:, last]
        )

    for d in range(1, degree + 1):
        B_new = np.zeros((x.shape[0], n_knots - 1 - d), dtype=np.float64)
        for i in range(n_knots - 1 - d):
            term = np.zeros_like(x)
            denom1 = knots[i + d] - knots[i]
            if denom1 > 0:
                term = term + (x - knots[i]) / denom1 * B[:, i]
            denom2 = knots[i + d + 1] - knots[i + 1]
            if denom2 > 0:
                term = term + (knots[i + d + 1] - x) / denom2 * B[:, i + 1]
            B_new[:, i] = term
        B = B_new
    return B[:, :n_basis]


def bs_numpy(x, df=None, knots=None, degree=3, intercept=False):
    # TODO(synk): numerically cross-validate against scipy.splev-based bs()
    # for both log=True and log=False spline_factory configurations.
    order = degree + 1
    inner_knots = []
    if df is not None and knots is None:
        n_inner_knots = df - order + (1 - intercept)
        if n_inner_knots < 0:
            n_inner_knots = 0
        if n_inner_knots > 0:
            inner_knots = np.percentile(
                x, 100 * np.linspace(0, 1, n_inner_knots + 2)[1:-1]
            )
    elif knots is not None:
        inner_knots = knots
    all_knots = np.concatenate(([np.min(x), np.max(x)] * order, inner_knots))
    all_knots.sort()
    basis = _cox_de_boor_basis(np.asarray(x, dtype=np.float64), all_knots, degree)
    if not intercept:
        basis = basis[:, 1:]
    return basis


def spline_factory_numpy(n, df, log=False):
    if log:
        dist = np.array(np.arange(n) - n / 2.0)
        dist = np.log(np.abs(dist) + 1) * (2 * (dist > 0) - 1)
        n_knots = df - 4
        knots = np.linspace(np.min(dist), np.max(dist), n_knots + 2)[1:-1]
        return bs_numpy(dist, knots=knots, intercept=True).astype(np.float32)
    else:
        dist = np.arange(n)
        return bs_numpy(dist, df=df, intercept=True).astype(np.float32)


# ----------------------------------------------------------------------------
# Lane-folding helpers
# ----------------------------------------------------------------------------
def _round_up(a, b):
    return ((a + b - 1) // b) * b


def _choose_fold(S, df):
    """Pick g so g*df (stores) and ideally g*S (loads) are multiples of 128.

    Invariant: never returns g > 1 unless (g*df) % 128 == 0.  Fallback is
    g=1 (unfolded: still correct, just lane-masked stores for small df).
    """
    if df % 128 == 0:
        return 1
    best = None
    for g in range(2, 129):
        if g * S > 4096:
            break
        if (g * df) % 128 != 0:
            continue
        if (g * S) % 128 == 0:
            return g            # fully lane-dense loads AND stores
        if best is None:
            best = g            # lane-dense stores at least
    return best if best is not None else 1


def _fold_weight_np(w, g):
    """Block-diagonal (g*S, g*df) weight: kron(I_g, W). Built once on host.

    Note: the block-diagonal trick means an Inf/NaN in one row multiplies
    zero weights belonging to the other g-1 rows in its fold group (0*Inf=NaN).
    For finite inputs the result is exactly x @ W.
    """
    w = np.asarray(w, dtype=np.float32)
    return np.kron(np.eye(g, dtype=np.float32), w)


# ----------------------------------------------------------------------------
# Pallas kernel: tiled (TILE_M, g*S) x (g*S, g*df) matmul on the MXU
# ----------------------------------------------------------------------------
def _bspline_matmul_kernel(x_ref, w_ref, o_ref, *, bf16_operands):
    x = x_ref[...]
    w = w_ref[...]
    if bf16_operands:
        # Opt-in for v5e (keeps the kernel DMA-bound instead of MXU-bound);
        # accumulation stays f32.  Default off for exact f32 parity.
        x = x.astype(jnp.bfloat16)
        w = w.astype(jnp.bfloat16)
    o_ref[...] = jnp.dot(
        x, w, preferred_element_type=jnp.float32
    ).astype(o_ref.dtype)


# 32 MiB scoped VMEM: raises v5e's 16 MiB default, matches v6e/v7x defaults,
# and stays well inside v7x's 64 MiB physical VMEM.
_VMEM_LIMIT_BYTES = 32 * 1024 * 1024
_TILE_M_CAP = 4096  # folded rows per grid step (per perf review, all gens)


@functools.partial(jax.jit, static_argnames=("g", "bf16_operands"))
def _bspline_apply(x, w_fold, *, g, bf16_operands=False):
    """x: (..., S); w_fold: (g*S, g*df) f32 block-diagonal spline weight."""
    lead = x.shape[:-1]
    S = x.shape[-1]
    gS, gdf = w_fold.shape
    assert gS == g * S, (gS, g, S)
    df = gdf // g
    M = int(np.prod(lead)) if lead else 1
    x2 = x.reshape(M, S)

    # Fold g consecutive rows into the lane axis (contiguous reshape, free).
    # Pad at most g-1 zero rows for g-divisibility; skip entirely when
    # M % g == 0 (the common case) so we never materialize a copy of x.
    M_fold = -(-M // g)
    M_pad = M_fold * g
    if M_pad > M:
        x2 = jnp.pad(x2, ((0, M_pad - M), (0, 0)))
    xf = x2.reshape(M_fold, gS)

    # Tile sizing: double-buffered input + output rows + resident weight,
    # sized to fit with headroom inside the 32 MiB scoped VMEM limit.
    bytes_per_row = (gS + gdf) * 4 * 2            # in + out, double-buffered
    weight_bytes = gS * gdf * 4 * 2               # resident weight (2 bufs)
    budget = max(_VMEM_LIMIT_BYTES - weight_bytes - (8 << 20), 0)
    tile_cap = max(8, (budget // bytes_per_row) // 8 * 8)
    tile_m = min(tile_cap, _TILE_M_CAP, _round_up(M_fold, 8))

    # Ragged last M block: Pallas masks edge-block stores; OOB rows' outputs
    # are discarded and (thanks to the zero pad-to-g) never share a fold
    # group with valid rows.
    grid = (pl.cdiv(M_fold, tile_m),)

    flops = 2 * M_fold * gS * gdf
    bytes_accessed = 4 * (M_fold * gS + gS * gdf + M_fold * gdf)

    kernel = functools.partial(_bspline_matmul_kernel, bf16_operands=bf16_operands)

    out = pl.pallas_call(
        kernel,
        out_shape=jax.ShapeDtypeStruct((M_fold, gdf), x.dtype),
        grid_spec=pltpu.PrefetchScalarGridSpec(
            num_scalar_prefetch=0,
            grid=grid,
            in_specs=[
                pl.BlockSpec((tile_m, gS), lambda i: (i, 0)),
                # Constant index_map: DMA issued once, weight stays resident.
                pl.BlockSpec((gS, gdf), lambda i: (0, 0)),
            ],
            out_specs=pl.BlockSpec((tile_m, gdf), lambda i: (i, 0)),
        ),
        compiler_params=pltpu.CompilerParams(
            # TODO(synk): on v7x, split the M axis across both TensorCores
            # (CORE_PARALLEL / explicit leading core axis) and confirm in the
            # trace that both cores issue DMAs.
            dimension_semantics=("parallel",),
            vmem_limit_bytes=_VMEM_LIMIT_BYTES,
        ),
        cost_estimate=pl.CostEstimate(
            flops=flops, transcendentals=0, bytes_accessed=bytes_accessed
        ),
    )(xf, w_fold)

    out = out.reshape(M_pad, df)[:M]
    return out.reshape(*lead, df)


# ----------------------------------------------------------------------------
# Public entry points
# ----------------------------------------------------------------------------
_W_FOLD_CACHE = {}


def bspline_transformation(x, spline_tr, *, bf16_operands=False):
    """x: (..., S) float32, spline_tr: (S, df) float32 -> (..., df).

    Matches torch.matmul(x, spline_tr).  The folded weight is cached so
    repeated calls don't redo np.kron / host->device upload.
    """
    tr_np = np.asarray(spline_tr, dtype=np.float32)
    S, df = tr_np.shape
    g = _choose_fold(S, df)
    key = (S, df, g, tr_np.tobytes())
    w_fold = _W_FOLD_CACHE.get(key)
    if w_fold is None:
        w_fold = jnp.asarray(_fold_weight_np(tr_np, g))
        _W_FOLD_CACHE[key] = w_fold
    return _bspline_apply(x, w_fold, g=g, bf16_operands=bf16_operands)


class BSplineTransformationPallas:
    """JAX/Pallas port of the PyTorch BSplineTransformation module."""

    def __init__(self, bins, log=False, scaled=False, bf16_operands=False):
        self._spline_tr = None      # (S, df) raw basis, for reference/debug
        self._w_fold = None         # (g*S, g*df) block-diagonal, device-resident
        self._g = None
        self._log = log
        self._scaled = scaled
        self._df = bins
        self._bf16_operands = bf16_operands

    def __call__(self, x):
        if self._w_fold is None:
            spatial_dim = x.shape[-1]
            tr = spline_factory_numpy(spatial_dim, self._df, log=self._log)
            if self._scaled:
                tr = tr / spatial_dim
            self._spline_tr = jnp.asarray(tr, dtype=jnp.float32)
            self._g = _choose_fold(spatial_dim, tr.shape[-1])
            # Build + upload the folded weight once.
            self._w_fold = jnp.asarray(_fold_weight_np(tr, self._g))
        return _bspline_apply(
            x, self._w_fold, g=self._g, bf16_operands=self._bf16_operands
        )


# ----------------------------------------------------------------------------
if __name__ == "__main__":
    key = jax.random.PRNGKey(0)
    B, C, H, S = 2, 4, 16, 16   # NCHW-style input; spline contracts last dim
    bins = 8                    # df (degrees of freedom of the spline basis)

    x = jax.random.normal(key, (B, C, H, S), dtype=jnp.float32)

    module = BSplineTransformationPallas(bins, log=False, scaled=False)
    out = jax.block_until_ready(module(x))

    # reference check against plain JAX matmul with the unfolded basis
    ref = jnp.matmul(x, module._spline_tr)
    assert out.shape == (B, C, H, bins), out.shape
    np.testing.assert_allclose(np.asarray(out), np.asarray(ref), rtol=1e-5, atol=1e-5)

    # also exercise a ragged path: M = 3*5*7 = 105 (not divisible by g=16)
    x2 = jax.random.normal(jax.random.PRNGKey(1), (3, 5, 7, S), dtype=jnp.float32)
    out2 = jax.block_until_ready(module(x2))
    ref2 = jnp.matmul(x2, module._spline_tr)
    assert out2.shape == (3, 5, 7, bins), out2.shape
    np.testing.assert_allclose(np.asarray(out2), np.asarray(ref2), rtol=1e-5, atol=1e-5)

    print("KERNEL_OK")
</pallas_src>

<mosaic_0001>
module attributes {stable_mosaic.version = 11 : i64} {
  func.func @_bspline_matmul_kernel(%arg0: i32, %arg1: memref<8x256xf32, #tpu.memory_space<vmem>>, %arg2: memref<256x128xf32, #tpu.memory_space<vmem>>, %arg3: memref<8x128xf32, #tpu.memory_space<vmem>>) attributes {dimension_semantics = [#tpu.dimension_semantics<parallel>], iteration_bounds = array<i64: 1>, scalar_prefetch = 0 : i64, scratch_operands = 0 : i64, tpu.core_type = #tpu.core_type<tc>, window_params = [{transform_indices = @transform_0, window_bounds = array<i64: 8, 256>}, {pipeline_mode = #tpu.pipeline_mode<synchronous>, transform_indices = @transform_1, window_bounds = array<i64: 256, 128>}, {transform_indices = @transform_2, window_bounds = array<i64: 8, 128>}]} {
    %c0 = arith.constant 0 : index
    %c0_0 = arith.constant 0 : index
    %0 = vector.load %arg1[%c0, %c0_0] : memref<8x256xf32, #tpu.memory_space<vmem>>, vector<8x256xf32>
    %c0_1 = arith.constant 0 : index
    %c0_2 = arith.constant 0 : index
    %1 = vector.load %arg2[%c0_1, %c0_2] : memref<256x128xf32, #tpu.memory_space<vmem>>, vector<256x128xf32>
    %cst = arith.constant dense<0.000000e+00> : vector<8x128xf32>
    %2 = tpu.matmul %0, %1, %cst {dimension_numbers = #tpu.dot_dimension_numbers<[1], [0], [0], [1], [0, 0, 1, 1], [], []>} : vector<8x256xf32>, vector<256x128xf32>, vector<8x128xf32> -> vector<8x128xf32>
    %c0_3 = arith.constant 0 : index
    %c0_4 = arith.constant 0 : index
    %3 = vector.load %arg3[%c0_3, %c0_4] : memref<8x128xf32, #tpu.memory_space<vmem>>, vector<8x128xf32>
    tpu.vector_store %arg3[%c0_3, %c0_4], %2 {strides = array<i32>} : memref<8x128xf32, #tpu.memory_space<vmem>>, vector<8x128xf32>,
    return
  }
  func.func @transform_0(%arg0: i32) -> (i32, i32) {
    %c0_i32 = arith.constant 0 : i32
    %c0_i32_0 = arith.constant 0 : i32
    return %arg0, %c0_i32 : i32, i32
  }
  func.func @transform_1(%arg0: i32) -> (i32, i32) {
    %c0_i32 = arith.constant 0 : i32
    %c0_i32_0 = arith.constant 0 : i32
    %c0_i32_1 = arith.constant 0 : i32
    return %c0_i32, %c0_i32_0 : i32, i32
  }
  func.func @transform_2(%arg0: i32) -> (i32, i32) {
    %c0_i32 = arith.constant 0 : i32
    %c0_i32_0 = arith.constant 0 : i32
    return %arg0, %c0_i32 : i32, i32
  }
}

</mosaic_0001>

<bundles_post_ra>
// kernel: _bspline_apply.1
= control target key start
LH: loop header
LB: loop body
LE: loop exit
PB: predicated region body
PF: predicated region fallthrough
CT: control target
= control target key end

     0   :  { %7 = vsyncpa [#allocation3], 0  ;;  %s195_s9 = smov [#allocation2]   ;;  %s225_s0 = inlined_call_operand.vmem [shape: f32[8,256], index: 0, kind: input, shape index: {}]   ;;  %s226_s1 = inlined_call_operand.hbm [shape: f32[256,128], index: 1, kind: input, shape index: {}]   ;;  %s227_s2 = inlined_call_operand.vmem [shape: f32[8,128], index: 2, kind: output, shape index: {}]  }
   0x1   :  { %s15_s10 = sshll.u32 %s195_s9, 4  ;;  %s16_s10 = int_to_ptr.vmem [resolvable:$true] %s15_s10 }
   0x2   :  { %s181_s11 = scalar_lea.vmem %s16_s10, 4096  ;;  %p186_p1 = scmp.lt.s32.totalorder %s16_s10, %s16_s10 }
   0x3   :  { %p182_p0 = scmp.ne.s32.totalorder %s16_s10, %s181_s11  ;;  %p187_p2 = scmp.lt.s32.totalorder %s181_s11, %s181_s11 }
   0x5   :  { %p188_p3 = por %p187_p2, %p186_p1 }
   0x7   :  { %p189_p4 = pnand %p188_p3, %p182_p0 }
   0x9   :  { %192 = shalt.err (!%p189_p4)
}
   0xa   :  { %s196_s12 = smov 128   ;;  %s197_s13 = smov 8  }
   0xb   :  { %21 = dma.hbm_to_vmem [thread:$0]  %s226_s1, 4096, %s16_s10, [#allocation3], %s196_s12, %s196_s12, %s197_s13  }
   0xc   :  { %193 = dma.done.wait [#allocation3], 4096  }
   0xd   :  { %194 = vsyncadd [#allocation3], 4294963200  ;;  %v58_v0 = vld [vmem:[#allocation2 + $0xf8] sm:$0xff]  ;;  %v57_v2 = vld [vmem:[#allocation2 + $0xf0] sm:$0xff] }
   0xe   :  { %v42_v1 = vld [vmem:[#allocation2 + $0x78] sm:$0xff]  ;;  %135 = vmatprep.subr.mxu0 %v58_v0  ;;  %v41_v3 = vld [vmem:[#allocation2 + $0x70] sm:$0xff]  ;;  %v56_v4 = vld [vmem:[#allocation2 + $0xe8] sm:$0xff] }
   0xf   :  { %136 = vmatpush3.msra.mxu0 %v42_v1  ;;  %v40_v5 = vld [vmem:[#allocation2 + $0x68] sm:$0xff]  ;;  %v55_v6 = vld [vmem:[#allocation2 + $0xe0] sm:$0xff]  ;;  %v54_v8 = vld [vmem:[#allocation2 + $0xd8] sm:$0xff] }
  0x10   :  { %137 = vmatprep.subr.mxu0 %v57_v2  ;;  %v39_v7 = vld [vmem:[#allocation2 + $0x60] sm:$0xff]  ;;  %v38_v9 = vld [vmem:[#allocation2 + $0x58] sm:$0xff]  ;;  %v53_v10 = vld [vmem:[#allocation2 + $0xd0] sm:$0xff] }
  0x11   :  { %138 = vmatpush3.msra.mxu0 %v41_v3  ;;  %v37_v11 = vld [vmem:[#allocation2 + $0x50] sm:$0xff]  ;;  %v52_v12 = vld [vmem:[#allocation2 + $0xc8] sm:$0xff]  ;;  %v51_v15 = vld [vmem:[#allocation2 + $0xc0] sm:$0xff] }
  0x12   :  { %139 = vmatprep.subr.mxu0 %v56_v4  ;;  %v26_v13 = vld [vmem:[%s225_s0 + $0x8] sm:$0xff]  ;;  %v35_v16 = vld [vmem:[#allocation2 + $0x40] sm:$0xff]  ;;  %v50_v17 = vld [vmem:[#allocation2 + $0xb8] sm:$0xff] }
  0x13   :  { %140 = vmatpush3.msra.mxu0 %v40_v5  ;;  %v36_v14 = vld [vmem:[#allocation2 + $0x48] sm:$0xff]  ;;  %123 = vmatprep.mubr.f32.mxu0 %v26_v13  ;;  %v34_v18 = vld [vmem:[#allocation2 + $0x38] sm:$0xff]  ;;  %v49_v19 = vld [vmem:[#allocation2 + $0xb0] sm:$0xff] }
  0x14   :  { %141 = vmatprep.subr.mxu0 %v55_v6  ;;  %v33_v20 = vld [vmem:[#allocation2 + $0x30] sm:$0xff]  ;;  %v48_v21 = vld [vmem:[#allocation2 + $0xa8] sm:$0xff]  ;;  %v47_v23 = vld [vmem:[#allocation2 + $0xa0] sm:$0xff] }
  0x15   :  { %142 = vmatpush3.msra.mxu0 %v39_v7  ;;  %v32_v22 = vld [vmem:[#allocation2 + $0x28] sm:$0xff]  ;;  %v31_v24 = vld [vmem:[#allocation2 + $0x20] sm:$0xff]  ;;  %v46_v25 = vld [vmem:[#allocation2 + $0x98] sm:$0xff] }
  0x16   :  { %143 = vmatprep.subr.mxu0 %v54_v8  ;;  %v30_v26 = vld [vmem:[#allocation2 + $0x18] sm:$0xff]  ;;  %v45_v27 = vld [vmem:[#allocation2 + $0x90] sm:$0xff]  ;;  %v44_v29 = vld [vmem:[#allocation2 + $0x88] sm:$0xff] }
  0x17   :  { %144 = vmatpush3.msra.mxu0 %v38_v9  ;;  %v29_v28 = vld [vmem:[#allocation2 + $0x10] sm:$0xff]  ;;  %v28_v30 = vld [vmem:[#allocation2 + $0x8] sm:$0xff]  ;;  %v43_v31 = vld [vmem:[#allocation2 + $0x80] sm:$0xff] }
  0x18   :  { %145 = vmatprep.subr.mxu0 %v53_v10  ;;  %v27_v32 = vld [vmem:[#allocation2] sm:$0xff] }
  0x19   :  { %146 = vmatpush3.msra.mxu0 %v37_v11  ;;  %v25_v33 = vld [vmem:[%s225_s0] sm:$0xff] }
  0x1a   :  { %147 = vmatprep.subr.mxu0 %v52_v12 }
  0x1b   :  { %148 = vmatpush3.msra.mxu0 %v36_v14 }
  0x1c   :  { %149 = vmatprep.subr.mxu0 %v51_v15 }
  0x1d   :  { %150 = vmatpush3.msra.mxu0 %v35_v16 }
  0x1e   :  { %151 = vmatprep.subr.mxu0 %v50_v17 }
  0x1f   :  { %152 = vmatpush3.msra.mxu0 %v34_v18 }
  0x20   :  { %153 = vmatprep.subr.mxu0 %v49_v19 }
  0x21   :  { %154 = vmatpush3.msra.mxu0 %v33_v20 }
  0x22   :  { %155 = vmatprep.subr.mxu0 %v48_v21 }
  0x23   :  { %156 = vmatpush3.msra.mxu0 %v32_v22 }
  0x24   :  { %157 = vmatprep.subr.mxu0 %v47_v23 }
  0x25   :  { %158 = vmatpush3.msra.mxu0 %v31_v24 }
  0x26   :  { %159 = vmatprep.subr.mxu0 %v46_v25 }
  0x27   :  { %160 = vmatpush3.msra.mxu0 %v30_v26 }
  0x28   :  { %161 = vmatprep.subr.mxu0 %v45_v27 }
  0x29   :  { %162 = vmatpush3.msra.mxu0 %v29_v28 }
  0x2a   :  { %163 = vmatprep.subr.mxu0 %v44_v29 }
  0x2b   :  { %164 = vmatpush3.msra.mxu0 %v28_v30 }
  0x2c   :  { %165 = vmatprep.subr.mxu0 %v43_v31 }
  0x2d   :  { %166 = vmatpush3.msra.mxu0 %v27_v32 }
  0x2e   :  { %124 = vmatmul.mubr.f32.vlgmr.msra.gmra.mxu0 %v25_v33 }
  0xee   :  { %v167_v34 = vpop.f32.mrf.mxu0 }
  0xf0   :  { %v168_v35 = vpop.f32.mrf.mxu0 }
  0xf1   :  { %v169_v36 = vadd.f32 %v168_v35, %v167_v34 }
  0xf3   :  { %129 = vst [vmem:[%s227_s2] sm:$0xff] %v169_v36 }
  0xf4   :  { %134 = vsyncpa [#allocation3], 1 }

</bundles_post_ra>
